<compile_context>
chip_gen: v6e
topology: v6e:2x2x1
jax: 0.10.0
libtpu: 0.0.40
codegen_flags: <defaults>
</compile_context>

<pallas_src>
import functools
import math

import jax
import jax.numpy as jnp
from jax.experimental import pallas as pl
from jax.experimental.pallas import tpu as pltpu


def _abs_diff_kernel(left_ref, right_ref, o_ref, *, w, maxdisp):
    # left_ref/right_ref: (1, C, TILE_S)  -- TILE_S = whole image rows, flattened
    # o_ref:              (1, maxdisp*C, TILE_S)
    c = left_ref.shape[1]
    tile_s = left_ref.shape[2]

    left = left_ref[...]
    right = right_ref[...]

    # Column index within each image row (hoisted out of the disparity loop).
    col = jax.lax.broadcasted_iota(jnp.int32, (1, c, tile_s), 2) % w

    parts = []
    for d in range(maxdisp):  # static unroll; maxdisp is small
        if d == 0:
            shifted = left
        else:
            # Bring left[..., j + d] to lane j (circular; wrapped lanes are masked).
            shifted = pltpu.roll(left, shift=tile_s - d, axis=2)
        diff = jnp.abs(shifted - right)
        parts.append(jnp.where(col < (w - d), diff, jnp.float32(0.0)))

    # Single full-block, lane-dense, unmasked store per grid step.
    o_ref[...] = jnp.concatenate(parts, axis=1)


def _pick_spatial_tile(s, w, c, maxdisp, vmem_budget_bytes=20 << 20):
    """Largest lane-dense spatial tile: whole image rows, multiple of 128,
    with the double-buffered (left + right + out) working set under budget."""
    bytes_per_lane = (2 + maxdisp) * c * 4            # f32 left + right + output
    max_lanes = max(vmem_budget_bytes // (2 * bytes_per_lane), 128)  # 2x double-buffer
    cap = min(max_lanes, 2048)                        # ~85% of HBM roofline at 512+
    if s <= cap:
        return s                                      # whole (H*W) slab; always legal
    step = (w * 128) // math.gcd(w, 128)              # lcm(w,128): whole rows + lane aligned
    tile = (cap // step) * step
    while tile >= step and s % tile != 0:
        tile -= step
    if tile >= step and s % tile == 0:
        return tile
    return s  # TODO(synk): ragged spatial tiling for H*W not divisible by lcm(W,128)


def abs_diff(left, right, maxdisp):
    n, c, h, w = left.shape
    assert right.shape == (n, c, h, w)
    s = h * w
    c_out = maxdisp * c

    # Free metadata reshapes: make the last (lane) dim H*W instead of W.
    left_f = left.reshape(n, c, s)
    right_f = right.reshape(n, c, s)

    tile_s = _pick_spatial_tile(s, w, c, maxdisp)
    grid = (n, s // tile_s)

    kernel = functools.partial(_abs_diff_kernel, w=w, maxdisp=maxdisp)

    out_f = pl.pallas_call(
        kernel,
        out_shape=jax.ShapeDtypeStruct((n, c_out, s), jnp.float32),
        grid=grid,
        in_specs=[
            pl.BlockSpec((1, c, tile_s), lambda i, j: (i, 0, j)),
            pl.BlockSpec((1, c, tile_s), lambda i, j: (i, 0, j)),
        ],
        out_specs=pl.BlockSpec((1, c_out, tile_s), lambda i, j: (i, 0, j)),
        compiler_params=pltpu.CompilerParams(
            dimension_semantics=("parallel", "parallel"),
            vmem_limit_bytes=32 << 20,   # safe on v7x (64 MiB phys) and v5e/v6e
        ),
    )(left_f, right_f)

    return out_f.reshape(n, c_out, h, w)


def abs_diff_ref(left, right, maxdisp):
    """Pure-JAX reference mirroring the PyTorch forward."""
    _, _, _, w = left.shape
    outs = []
    for d in range(maxdisp):
        diff = jnp.abs(left[:, :, :, d:] - right[:, :, :, : w - d])
        diff = jnp.pad(diff, ((0, 0), (0, 0), (0, 0), (0, d)))
        outs.append(diff)
    return jnp.concatenate(outs, axis=1).astype(jnp.float32)


if __name__ == "__main__":
    key = jax.random.PRNGKey(0)
    kl, kr = jax.random.split(key)
    N, C, H, W = 2, 4, 16, 16
    MAXDISP = 4

    left = jax.random.uniform(kl, (N, C, H, W), jnp.float32)
    right = jax.random.uniform(kr, (N, C, H, W), jnp.float32)

    out = abs_diff(left, right, MAXDISP)
    jax.block_until_ready(out)

    ref = abs_diff_ref(left, right, MAXDISP)
    assert out.shape == (N, MAXDISP * C, H, W), out.shape
    assert out.dtype == jnp.float32
    assert jnp.allclose(out, ref, rtol=1e-6, atol=1e-6)

    print("KERNEL_OK")
</pallas_src>

<mosaic_0001>
module attributes {stable_mosaic.version = 11 : i64} {
  func.func @_abs_diff_kernel(%arg0: i32, %arg1: i32, %arg2: memref<1x4x256xf32, #tpu.memory_space<vmem>>, %arg3: memref<1x4x256xf32, #tpu.memory_space<vmem>>, %arg4: memref<1x16x256xf32, #tpu.memory_space<vmem>>) attributes {dimension_semantics = [#tpu.dimension_semantics<parallel>, #tpu.dimension_semantics<parallel>], iteration_bounds = array<i64: 2, 1>, scalar_prefetch = 0 : i64, scratch_operands = 0 : i64, tpu.core_type = #tpu.core_type<tc>, window_params = [{transform_indices = @transform_0, window_bounds = array<i64: 1, 4, 256>}, {transform_indices = @transform_1, window_bounds = array<i64: 1, 4, 256>}, {transform_indices = @transform_2, window_bounds = array<i64: 1, 16, 256>}]} {
    %c0 = arith.constant 0 : index
    %c0_0 = arith.constant 0 : index
    %c0_1 = arith.constant 0 : index
    %0 = vector.load %arg2[%c0, %c0_0, %c0_1] : memref<1x4x256xf32, #tpu.memory_space<vmem>>, vector<1x4x256xf32>
    %c0_2 = arith.constant 0 : index
    %c0_3 = arith.constant 0 : index
    %c0_4 = arith.constant 0 : index
    %1 = vector.load %arg3[%c0_2, %c0_3, %c0_4] : memref<1x4x256xf32, #tpu.memory_space<vmem>>, vector<1x4x256xf32>
    %2 = tpu.iota {dimensions = array<i32: 2>} : vector<1x4x256xi32>
    %c16_i32 = arith.constant 16 : i32
    %c0_i32 = arith.constant 0 : i32
    %3 = arith.cmpi eq, %c16_i32, %c0_i32 : i32
    %c1_i32 = arith.constant 1 : i32
    %4 = arith.select %3, %c1_i32, %c16_i32 : i32
    %5 = vector.broadcast %4 : i32 to vector<1x4x256xi32>
    %6 = arith.remsi %2, %5 : vector<1x4x256xi32>
    %c0_i32_5 = arith.constant 0 : i32
    %7 = vector.broadcast %c0_i32_5 : i32 to vector<1x4x256xi32>
    %8 = arith.cmpi ne, %6, %7 : vector<1x4x256xi32>
    %c0_i32_6 = arith.constant 0 : i32
    %9 = vector.broadcast %c0_i32_6 : i32 to vector<1x4x256xi32>
    %10 = arith.cmpi slt, %6, %9 : vector<1x4x256xi32>
    %c0_i32_7 = arith.constant 0 : i32
    %11 = arith.cmpi slt, %4, %c0_i32_7 : i32
    %12 = vector.broadcast %11 : i1 to vector<1x4x256xi1>
    %13 = vector.broadcast %12 : vector<1x4x256xi1> to vector<1x4x256xi1>
    %14 = arith.xori %10, %13 : vector<1x4x256xi1>
    %15 = arith.andi %14, %8 : vector<1x4x256xi1>
    %16 = vector.broadcast %4 : i32 to vector<1x4x256xi32>
    %17 = arith.addi %6, %16 : vector<1x4x256xi32>
    %18 = arith.select %15, %17, %6 : vector<1x4x256xi1>, vector<1x4x256xi32>
    %19 = arith.subf %0, %1 : vector<1x4x256xf32>
    %20 = math.absf %19 : vector<1x4x256xf32>
    %c16_i32_8 = arith.constant 16 : i32
    %21 = vector.broadcast %c16_i32_8 : i32 to vector<1x4x256xi32>
    %22 = arith.cmpi slt, %18, %21 : vector<1x4x256xi32>
    %cst = arith.constant 0.000000e+00 : f32
    %23 = vector.broadcast %cst : f32 to vector<1x4x256xf32>
    %24 = arith.select %22, %20, %23 : vector<1x4x256xi1>, vector<1x4x256xf32>
    %c255_i32 = arith.constant 255 : i32
    %25 = tpu.dynamic_rotate %0 by %c255_i32 dim 2 : vector<1x4x256xf32>, i32 -> vector<1x4x256xf32>
    %26 = arith.subf %25, %1 : vector<1x4x256xf32>
    %27 = math.absf %26 : vector<1x4x256xf32>
    %c15_i32 = arith.constant 15 : i32
    %28 = vector.broadcast %c15_i32 : i32 to vector<1x4x256xi32>
    %29 = arith.cmpi slt, %18, %28 : vector<1x4x256xi32>
    %cst_9 = arith.constant 0.000000e+00 : f32
    %30 = vector.broadcast %cst_9 : f32 to vector<1x4x256xf32>
    %31 = arith.select %29, %27, %30 : vector<1x4x256xi1>, vector<1x4x256xf32>
    %c254_i32 = arith.constant 254 : i32
    %32 = tpu.dynamic_rotate %0 by %c254_i32 dim 2 : vector<1x4x256xf32>, i32 -> vector<1x4x256xf32>
    %33 = arith.subf %32, %1 : vector<1x4x256xf32>
    %34 = math.absf %33 : vector<1x4x256xf32>
    %c14_i32 = arith.constant 14 : i32
    %35 = vector.broadcast %c14_i32 : i32 to vector<1x4x256xi32>
    %36 = arith.cmpi slt, %18, %35 : vector<1x4x256xi32>
    %cst_10 = arith.constant 0.000000e+00 : f32
    %37 = vector.broadcast %cst_10 : f32 to vector<1x4x256xf32>
    %38 = arith.select %36, %34, %37 : vector<1x4x256xi1>, vector<1x4x256xf32>
    %c253_i32 = arith.constant 253 : i32
    %39 = tpu.dynamic_rotate %0 by %c253_i32 dim 2 : vector<1x4x256xf32>, i32 -> vector<1x4x256xf32>
    %40 = arith.subf %39, %1 : vector<1x4x256xf32>
    %41 = math.absf %40 : vector<1x4x256xf32>
    %c13_i32 = arith.constant 13 : i32
    %42 = vector.broadcast %c13_i32 : i32 to vector<1x4x256xi32>
    %43 = arith.cmpi slt, %18, %42 : vector<1x4x256xi32>
    %cst_11 = arith.constant 0.000000e+00 : f32
    %44 = vector.broadcast %cst_11 : f32 to vector<1x4x256xf32>
    %45 = arith.select %43, %41, %44 : vector<1x4x256xi1>, vector<1x4x256xf32>
    %46 = tpu.concatenate %24, %31, %38, %45 in 1 : vector<1x4x256xf32>, vector<1x4x256xf32>, vector<1x4x256xf32>, vector<1x4x256xf32> -> vector<1x16x256xf32>
    %c0_12 = arith.constant 0 : index
    %c0_13 = arith.constant 0 : index
    %c0_14 = arith.constant 0 : index
    %47 = vector.load %arg4[%c0_12, %c0_13, %c0_14] : memref<1x16x256xf32, #tpu.memory_space<vmem>>, vector<1x16x256xf32>
    tpu.vector_store %arg4[%c0_12, %c0_13, %c0_14], %46 {strides = array<i32>} : memref<1x16x256xf32, #tpu.memory_space<vmem>>, vector<1x16x256xf32>,
    return
  }
  func.func @transform_0(%arg0: i32, %arg1: i32) -> (i32, i32, i32) {
    %c0_i32 = arith.constant 0 : i32
    %c0_i32_0 = arith.constant 0 : i32
    return %arg0, %c0_i32, %arg1 : i32, i32, i32
  }
  func.func @transform_1(%arg0: i32, %arg1: i32) -> (i32, i32, i32) {
    %c0_i32 = arith.constant 0 : i32
    %c0_i32_0 = arith.constant 0 : i32
    return %arg0, %c0_i32, %arg1 : i32, i32, i32
  }
  func.func @transform_2(%arg0: i32, %arg1: i32) -> (i32, i32, i32) {
    %c0_i32 = arith.constant 0 : i32
    %c0_i32_0 = arith.constant 0 : i32
    return %arg0, %c0_i32, %arg1 : i32, i32, i32
  }
}

</mosaic_0001>

<bundles_post_ra>
// kernel: tpu_custom_call.1
= control target key start
LH: loop header
LB: loop body
LE: loop exit
PB: predicated region body
PF: predicated region fallthrough
CT: control target
= control target key end

     0   :  { %7 = vsyncpa [#allocation3], 0  ;;  %s905_s0 = inlined_call_operand.hbm [shape: f32[2,4,256], index: 0, kind: input, shape index: {}]   ;;  %s906_s1 = inlined_call_operand.hbm [shape: f32[2,4,256], index: 1, kind: input, shape index: {}]   ;;  %s907_s2 = inlined_call_operand.hbm [shape: f32[2,16,256], index: 2, kind: output, shape index: {}]  }
   0x1   :  { %9 = vsyncpa [#allocation3 + $0x1], 0 }
   0x2   :  { %10 = vsyncpa [#allocation6], 0 }
   0x3   :  { %12 = vsyncpa [#allocation6 + $0x1], 0 }
   0x4   :  { %13 = vsyncpa [#allocation4], 0 }
   0x5   :  { %15 = vsyncpa [#allocation4 + $0x1], 0  ;;  %s723_s9 = smov 0   ;;  %s725_s10 = smov 0  }
   0x6   :  { %s727_s11 = smov 0   ;;  %s729_s12 = smov 0  }
   0x7   :  { %s731_s13 = smov 0   ;;  %s733_s14 = smov 0  }
   0x8 LB: > { %s462_s15 = sadd.s32 4294967295, %s698_s14   ;;  %s463_s16 = sadd.s32 4294967294, %s698_s14   ;;  %s698_s14 = sphi %s733_s14, %s21_s14   ;;  %s694_s13 = sphi %s731_s13, %s919_s13   ;;  %s690_s12 = sphi %s729_s12, %s918_s12   ;;  %s686_s11 = sphi %s727_s11, %s917_s11   ;;  %s682_s10 = sphi %s725_s10, %s916_s10   ;;  %s678_s9 = sphi %s723_s9, %s915_s9  }
   0x9   : > { %s33_s17 = sadd.s32 1, %s694_s13  ;;  %s42_s18 = sadd.s32 1, %s686_s11 }
   0xa   : > { %p35_p0 = scmp.ge.s32.totalorder %s33_s17, 2  ;;  %p49_p1 = scmp.ne.s32.totalorder %s686_s11, %s682_s10 }
   0xb   : > { %p50_p2 = scmp.eq.s32.totalorder %s698_s14, 0  ;;  %p55_p3 = scmp.ne.s32.totalorder %s682_s10, %s678_s9 }
   0xc   : > { %s921_s17 = smov (%p35_p0, %s33_s17), 0  ;;  %p56_p5 = scmp.eq.s32.totalorder %s462_s15, 0 }
   0xd   : > { %p764_p4 = por %p50_p2, %p49_p1  ;;  %s37_s20 = ssub.s32 %s694_s13, %s921_s17 }
   0xe   : > { %p109_p6 = scmp.eq.s32.totalorder %s462_s15, 1  ;;  %p40_p7 = scmp.eq.s32.totalorder %s37_s20, 0 }
   0xf   : > { %p770_p8 = por %p56_p5, %p55_p3  ;;  %p115_p10 = scmp.eq.s32.totalorder %s463_s16, 1 }
  0x10   : > { %p774_p9 = por %p109_p6, %p49_p1  ;;  %p501_p13 = scmp.lt.s32.totalorder %s698_s14, 2 }
  0x11   : > { %s779_s23 = scalar_select %p40_p7, %s686_s11, %s42_s18  }
  0x12   : > { %p781_p11 = por %p115_p10, %p55_p3  ;;  %s788_s25 = sand.u32 1, %s686_s11  }
  0x13   : > { %s466_s26 = sshll.u32 %s788_s25, 3  ;;  %s481_s27 = sshll.u32 %s694_s13, 7 }
  0x14   : > { %s147_s30 = scalar_lea.hbm %s905_s0, %s481_s27  ;;  %s139_s3 = scalar_lea.vmem [#allocation2], %s466_s26 }
  0x15   : > { %s149_s4 = sshll.u32 %s139_s3, 4  ;;  %p797_p0 = pnand %p501_p13, %p764_p4  ;;  %s150_s4 = int_to_ptr.vmem [resolvable:$true] %s149_s4 }
  0x16   : > { %p472_p1 = scmp.ge.s32.totalorder %s698_s14, 1  ;;  %p175_p2 = scmp.lt.s32.totalorder %s698_s14, 3 }
  0x17   : > { %s136_s6 = scalar_lea.sflag [#allocation3], %s788_s25  ;;  %p560_p3 = pneg %p797_p0 }
  0x18   : > { %s571_s7 = scalar_lea.vmem %s150_s4, 128  ;;  %s700_s8 = smov [#allocation2]  }
  0x19   : > { %p572_p5 = scmp.ne.s32.totalorder %s150_s4, %s571_s7  ;;  %s576_s15 = sshll.u32 %s700_s8, 4  ;;  %s577_s15 = int_to_ptr.vmem [resolvable:$false] %s576_s15 }
  0x1a   : > { %s578_s16 = scalar_lea.vmem %s577_s15, 256  ;;  %p579_p4 = scmp.lt.s32.totalorder %s150_s4, %s577_s15 }
  0x1b   : > { %p574_p6 = pnand %p572_p5, %p560_p3  ;;  %p580_p10 = scmp.lt.s32.totalorder %s578_s16, %s571_s7 }
  0x1d   : > { %p575_p7 = pneg %p574_p6  ;;  %p581_p13 = por %p580_p10, %p579_p4 }
  0x1f   : > { %p582_p12 = pnand %p581_p13, %p575_p7 }
  0x21   : > { %585 = shalt.err (!%p582_p12)
}
  0x22   : > { %493 = dma.hbm_to_vmem [thread:$0]  (!%p797_p0), %s147_s30, 128, %s150_s4, %s136_s6  }
  0x23   : > { %p815_p5 = pnand %p472_p1, %p175_p2  ;;  %s168_s28 = scalar_lea.hbm %s906_s1, %s481_s27 }
  0x24   : > { %s160_s29 = scalar_lea.vmem [#allocation5], %s466_s26  ;;  %s157_s7 = scalar_lea.sflag [#allocation6], %s788_s25 }
  0x25   : > { %s170_s3 = sshll.u32 %s160_s29, 4  ;;  %s701_s30 = smov [#allocation5]   ;;  %s171_s3 = int_to_ptr.vmem [resolvable:$true] %s170_s3 }
  0x26   : > { %s599_s8 = scalar_lea.vmem %s171_s3, 128  ;;  %s604_s4 = sshll.u32 %s701_s30, 4  ;;  %s605_s4 = int_to_ptr.vmem [resolvable:$false] %s604_s4 }
  0x27   : > { %p600_p12 = scmp.ne.s32.totalorder %s171_s3, %s599_s8  ;;  %s606_s6 = scalar_lea.vmem %s605_s4, 256 }
  0x28   : > { %p607_p1 = scmp.lt.s32.totalorder %s171_s3, %s605_s4  ;;  %p608_p2 = scmp.lt.s32.totalorder %s606_s6, %s599_s8 }
  0x29   : > { %p602_p6 = pnand %p600_p12, %p560_p3 }
  0x2a   : > { %p609_p4 = por %p608_p2, %p607_p1 }
  0x2b   : > { %p603_p7 = pneg %p602_p6 }
  0x2d   : > { %p610_p10 = pnand %p609_p4, %p603_p7 }
  0x2f   : > { %613 = shalt.err (!%p610_p10)
}
  0x30   : > { %496 = dma.hbm_to_vmem [thread:$0]  (!%p797_p0), %s168_s28, 128, %s171_s3, %s157_s7  }
  0x31   : > { %179 = sbr.rel (%p815_p5) target bundleno = 203 (0xcb), region = 28  ;;  %s831_s25 = sand.u32 (!%p815_p5), 1, %s682_s10  }
  0x32   : > { %s473_s26 = sshll.u32 (!%p815_p5), %s831_s25, 3  ;;  %s182_s27 = scalar_lea.sflag (!%p815_p5), [#allocation3], %s831_s25 }
  0x33   : > { %s185_s15 = scalar_lea.vmem (!%p815_p5), [#allocation2], %s473_s26 }
  0x36   : > { %665 = dma.done.wait (%p770_p8), %s182_s27, 128  }
  0x37   : > { %667 = vsyncadd (%p770_p8), %s182_s27, 4294967168  ;;  %s191_s5 = scalar_lea.sflag [#allocation6], %s831_s25  ;;  %s194_s16 = scalar_lea.vmem [#allocation5], %s473_s26 }
  0x38   : > { %669 = dma.done.wait (%p770_p8), %s191_s5, 128  }
  0x39   : > { %671 = vsyncadd (%p770_p8), %s191_s5, 4294967168  ;;  %v223_v0 = vld [vmem:[%s185_s15] sm:$0xff]  ;;  %s702_s18 = smov 125   ;;  %s703_s19 = smov 127   ;;  %v225_v2 = vlaneseq  ;;  %v224_v4 = vld [vmem:[%s194_s16] sm:$0xff]  ;;  %vm324_vm6 = vcmask 1043456  }
  0x3a   : > { %297 = vrot.lane.b32.xlu1 %v223_v0, %s702_s18  ;;  %264 = vrot.lane.b32.xlu0 %v223_v0, %s703_s19  ;;  %v262_v1 = vcombine.high %v223_v0, %v223_v0  ;;  %s704_s20 = smov 126   ;;  %v252_v8 = vsub.f32 %v223_v0, %v224_v4  ;;  %v272_v9 = vcombine.high %v224_v4, %v224_v4  ;;  %s475_s21 = sshll.u32 %s831_s25, 5 }
  0x3b   : > { %v226_v3 = vand.u32 127, %v225_v2  ;;  %s483_s28 = sshll.u32 %s690_s12, 9  ;;  %s219_s29 = scalar_lea.vmem [#allocation7], %s475_s21 }
  0x3c   : > { %v253_v14 = vand.u32 2147483647, %v252_v8  ;;  %s349_s3 = sshll.u32 %s219_s29, 4  ;;  %s854_s12 = scalar_lea.hbm %s907_s2, %s483_s28  ;;  %s856_s3 = int_to_ptr.vmem [resolvable:$true] %s349_s3 }
  0x3d   : > { %v227_v5 = vadd.s32 128, %v226_v3  ;;  %vm301_vm0 = vcmp.lt.s32.totalorder %v226_v3, 125  ;;  %vm268_vm1 = vcmp.lt.s32.totalorder %v226_v3, 127  ;;  %v232_v10 = vand.u32 15, %v226_v3  ;;  %s334_s30 = scalar_lea.sflag [#allocation4], %s831_s25  ;;  %s614_s4 = scalar_lea.vmem %s856_s3, 512 }
  0x3e   : > { %299 = vrot.lane.b32.xlu1 %v262_v1, %s702_s18  ;;  %266 = vrot.lane.b32.xlu0 %v262_v1, %s703_s19  ;;  %vm286_vm2 = vcmp.lt.s32.totalorder %v226_v3, 126  ;;  %v257_v32 = vcombine.high %v253_v14, %v253_v14  ;;  %p615_p8 = scmp.ne.s32.totalorder %s856_s3, %s614_s4  ;;  %s705_s6 = smov [#allocation7]  }
  0x3f   : > { %v239_v11 = vand.u32 15, %v227_v5  ;;  %vm308_vm3 = vcmp.lt.s32.totalorder %v232_v10, 13  ;;  %vm278_vm4 = vcmp.lt.s32.totalorder %v232_v10, 15  ;;  %vm293_vm8 = vcmp.lt.s32.totalorder %v232_v10, 14  ;;  %s618_s26 = sshll.u32 %s705_s6, 4  ;;  %s619_s26 = int_to_ptr.vmem [resolvable:$false] %s618_s26 }
  0x40   : > { %p616_p0 = pnand %p615_p8, %p774_p9  ;;  %s620_s27 = scalar_lea.vmem %s619_s26, 1024 }
  0x41   : > { %vm279_vm5 = vcmp.lt.s32.totalorder %v239_v11, 15  ;;  %vm309_vm7 = vcmp.lt.s32.totalorder %v239_v11, 13  ;;  %vm294_vm9 = vcmp.lt.s32.totalorder %v239_v11, 14  ;;  %p621_p13 = scmp.lt.s32.totalorder %s856_s3, %s619_s26  ;;  %p622_p5 = scmp.lt.s32.totalorder %s620_s27, %s614_s4 }
  0x42   : > { %284 = vrot.lane.b32.xlu1 %v262_v1, %s704_s20  ;;  %282 = vrot.lane.b32.xlu0 %v223_v0, %s704_s20  ;;  %p617_p3 = pneg %p616_p0 }
  0x43   : > { %p623_p12 = por %p622_p5, %p621_p13 }
  0x45   : > { %p624_p6 = pnand %p623_p12, %p617_p3 }
  0xac   : > { %v298_v6 = vpop.permute.xlu1 %297  ;;  %v265_v7 = vpop.permute.xlu0 %264 }
  0xb0   : > { %v300_v12 = vpop.permute.xlu1 %299  ;;  %v267_v13 = vpop.permute.xlu0 %266 }
  0xb1   : > { %v302_v15 = vsel %vm301_vm0, %v298_v6, %v300_v12  ;;  %v303_v16 = vsel %vm301_vm0, %v300_v12, %v298_v6  ;;  %v269_v17 = vsel %vm268_vm1, %v265_v7, %v267_v13  ;;  %v270_v18 = vsel %vm268_vm1, %v267_v13, %v265_v7 }
  0xb2   : > { %v304_v19 = vsub.f32 %v302_v15, %v224_v4  ;;  %v305_v20 = vsub.f32 %v303_v16, %v272_v9  ;;  %v274_v21 = vsub.f32 %v269_v17, %v224_v4  ;;  %v275_v22 = vsub.f32 %v270_v18, %v272_v9 }
  0xb4   : > { %v306_v23 = vand.u32 2147483647, %v304_v19  ;;  %v307_v24 = vand.u32 2147483647, %v305_v20  ;;  %v276_v25 = vand.u32 2147483647, %v274_v21  ;;  %v285_v26 = vpop.permute.xlu1 %284  ;;  %v283_v27 = vpop.permute.xlu0 %282 }
  0xb5   : > { %v277_v28 = vand.u32 2147483647, %v275_v22  ;;  %v287_v29 = vsel %vm286_vm2, %v283_v27, %v285_v26  ;;  %v288_v30 = vsel %vm286_vm2, %v285_v26, %v283_v27 }
  0xb6   : > { %v310_v31 = vsel %vm308_vm3, %v306_v23, 0.0  ;;  %v280_v33 = vsel %vm278_vm4, %v276_v25, 0.0  ;;  %v289_v34 = vsub.f32 %v287_v29, %v224_v4  ;;  %v311_v37 = vsel %vm309_vm7, %v307_v24, 0.0 }
  0xb7   : > { %v281_v35 = vsel %vm279_vm5, %v277_v28, 0.0  ;;  %v314_v36 = vrot.slane %v280_v33, 4  ;;  %v290_v39 = vsub.f32 %v288_v30, %v272_v9  ;;  %v320_v41 = vrot.slane %v310_v31, 4 }
  0xb8   : > { %v315_v38 = vrot.slane %v281_v35, 4  ;;  %v291_v40 = vand.u32 2147483647, %v289_v34  ;;  %v321_v46 = vrot.slane %v311_v37, 4 }
  0xb9   : > { %v325_v42 = vsel %vm324_vm6, %v253_v14, %v314_v36  ;;  %v292_v44 = vand.u32 2147483647, %v290_v39 }
  0xba   : > { %v326_v43 = vsel %vm324_vm6, %v257_v32, %v315_v38  ;;  %329 = vst [vmem:[%s219_s29] sm:$0xff] %v325_v42  ;;  %v295_v45 = vsel %vm293_vm8, %v291_v40, 0.0 }
  0xbb   : > { %330 = vst [vmem:[%s219_s29 + $0x8] sm:$0xff] %v326_v43  ;;  %v327_v47 = vsel %vm324_vm6, %v295_v45, %v320_v41  ;;  %v296_v48 = vsel %vm294_vm9, %v292_v44, 0.0 }
  0xbc   : > { %331 = vst [vmem:[%s219_s29 + $0x10] sm:$0xff] %v327_v47  ;;  %v328_v49 = vsel %vm324_vm6, %v296_v48, %v321_v46 }
  0xbd   : > { %332 = vst [vmem:[%s219_s29 + $0x18] sm:$0xff] %v328_v49 }
  0xbe   : > { %627 = shalt.err (!%p624_p6)
}
  0xbf   : > { %s628_s15 = scalar_lea.hbm %s854_s12, 512  ;;  %s632_s18 = scalar_lea.hbm %s907_s2, 1024 }
  0xc0   : > { %p629_p7 = scmp.ne.s32.totalorder %s854_s12, %s628_s15  ;;  %p633_p4 = scmp.lt.s32.totalorder %s854_s12, %s907_s2 }
  0xc1   : > { %p634_p10 = scmp.lt.s32.totalorder %s632_s18, %s628_s15 }
  0xc2   : > { %p630_p1 = pnand %p629_p7, %p774_p9 }
  0xc3   : > { %p635_p8 = por %p634_p10, %p633_p4 }
  0xc4   : > { %p631_p2 = pneg %p630_p1 }
  0xc6   : > { %p636_p0 = pnand %p635_p8, %p631_p2 }
  0xc8   : > { %639 = shalt.err (!%p636_p0)
}
  0xc9   : > { %s706_s21 = smov 256   ;;  %s707_s28 = smov 16  }
  0xca   : > { %488 = dma.vmem_to_hbm [thread:$0]  (%p774_p9), %s856_s3, 512, %s854_s12, %s334_s30, %s706_s21, %s706_s21, %s707_s28  }
  0xcb PF: > { %s364_s29 = sand.u32 1, %s678_s9   ;;  %p914_p3 = scmp.ge.s32.totalorder %s698_s14, 2 }
  0xcc   : > { %s365_s7 = scalar_lea.sflag [#allocation4], %s364_s29 }
  0xcd   : > { %p498_p13 = pnand %p914_p3, %p781_p11 }
  0xcf   : > { %p499_p5 = pneg %p498_p13 }
  0xd1   : > { %673 = dma.done.wait (%p499_p5), %s365_s7, 512  }
  0xd2   : > { %675 = vsyncadd (%p499_p5), %s365_s7, 4294966784  ;;  %s21_s14 = sadd.s32 1, %s698_s14   ;;  %s915_s9 = smov %s682_s10 }
  0xd3   : > { %p18_p12 = scmp.ge.s32.totalorder %s21_s14, 4   ;;  %s916_s10 = smov %s686_s11 }
  0xd4   : > { %s917_s11 = smov %s779_s23  ;;  %s918_s12 = smov %s694_s13 }
  0xd5   : > { %s919_s13 = smov %s921_s17  ;;  %20 = sbr.rel (!%p18_p12) target bundleno = 8 (0x8), region = 86 }
  0xda   :  { %370 = vsyncpa [#allocation3], 1 }
  0xdb   :  { %372 = vsyncpa [#allocation3 + $0x1], 1 }
  0xdc   :  { %373 = vsyncpa [#allocation6], 1 }
  0xdd   :  { %375 = vsyncpa [#allocation6 + $0x1], 1 }
  0xde   :  { %376 = vsyncpa [#allocation4], 1 }
  0xdf   :  { %378 = vsyncpa [#allocation4 + $0x1], 1 }

</bundles_post_ra>
